<compile_context>
chip_gen: v7x
topology: tpu7x:2x2x1
jax: 0.10.0
libtpu: 0.0.40
codegen_flags: <defaults>
</compile_context>

<pallas_src>
import numpy as np
import jax
import jax.numpy as jnp
from jax.experimental import pallas as pl
from jax.experimental.pallas import tpu as pltpu

_LANE = 128


def _diag_gaussian_kernel(mean_ref, std_ref, bits1_ref, bits2_ref, out_ref):
    # bits1/bits2: (TB//2, dim) uint32, out: (TB, dim) f32.
    half = bits1_ref.shape[0]

    inv24 = jnp.float32(1.0 / (1 << 24))
    # High 24 bits -> uniform strictly inside (0, 1).  Shift result fits in
    # int32, keeping the int->float convert on the natively supported path.
    u1 = ((bits1_ref[...] >> jnp.uint32(8)).astype(jnp.int32).astype(jnp.float32)
          + jnp.float32(0.5)) * inv24
    u2 = ((bits2_ref[...] >> jnp.uint32(8)).astype(jnp.int32).astype(jnp.float32)
          + jnp.float32(0.5)) * inv24

    # Box-Muller: use BOTH outputs -> one uniform pair fills two output rows.
    r = jnp.sqrt(jnp.float32(-2.0) * jnp.log(u1))
    theta = jnp.float32(2.0 * np.pi) * u2
    z1 = r * jnp.cos(theta)
    z2 = r * jnp.sin(theta)

    m = mean_ref[...]   # (1, dim), broadcast over rows
    s = std_ref[...]    # (1, dim)
    out_ref[:half, :] = m + s * z1
    out_ref[half:, :] = m + s * z2


def diagonal_gaussian_sample(batch_size, mean, stddev, key, *, tile_rows=None):
    """JAX/Pallas equivalent of DiagonalGaussianDistribution.forward(batch_size)."""
    dim = mean.shape[0]
    dim_p = ((dim + _LANE - 1) // _LANE) * _LANE          # lane-dense output

    if tile_rows is None:
        # ~2 MiB f32 output tile; rows a multiple of 16 so each Box-Muller
        # half-tile is sublane-aligned (multiple of 8 rows).
        target = max(16, ((2 * 1024 * 1024) // (4 * dim_p)) // 16 * 16)
        batch_16 = ((batch_size + 15) // 16) * 16
        tile_rows = min(target, batch_16)
    tile_rows = max(16, (tile_rows // 16) * 16)

    batch_p = ((batch_size + tile_rows - 1) // tile_rows) * tile_rows
    num_tiles = batch_p // tile_rows
    half = tile_rows // 2

    mean_p = jnp.zeros((1, dim_p), jnp.float32).at[0, :dim].set(
        mean.astype(jnp.float32))
    std_p = jnp.zeros((1, dim_p), jnp.float32).at[0, :dim].set(
        stddev.astype(jnp.float32))

    # Deterministic raw bits; each output row consumes its own bits so every
    # batch tile (and every TensorCore on v7x) sees independent samples.
    bits = jax.random.bits(key, (2, batch_p // 2, dim_p), jnp.uint32)
    bits1, bits2 = bits[0], bits[1]

    cost = pl.CostEstimate(
        flops=10 * batch_p * dim_p,
        transcendentals=2 * batch_p * dim_p,
        bytes_accessed=8 * batch_p * dim_p + 8 * dim_p,
    )

    out = pl.pallas_call(
        _diag_gaussian_kernel,
        out_shape=jax.ShapeDtypeStruct((batch_p, dim_p), jnp.float32),
        grid_spec=pltpu.PrefetchScalarGridSpec(
            num_scalar_prefetch=0,
            grid=(num_tiles,),
            in_specs=[
                pl.BlockSpec((1, dim_p), lambda i: (0, 0)),       # mean (resident)
                pl.BlockSpec((1, dim_p), lambda i: (0, 0)),       # stddev (resident)
                pl.BlockSpec((half, dim_p), lambda i: (i, 0)),    # bits1
                pl.BlockSpec((half, dim_p), lambda i: (i, 0)),    # bits2
            ],
            out_specs=pl.BlockSpec((tile_rows, dim_p), lambda i: (i, 0)),
        ),
        compiler_params=pltpu.CompilerParams(
            dimension_semantics=("parallel",),        # megacore sharding on v7x
            vmem_limit_bytes=32 * 1024 * 1024,        # explicit, fits v7x too
        ),
        cost_estimate=cost,
    )(mean_p, std_p, bits1, bits2)

    return out[:batch_size, :dim]


if __name__ == "__main__":
    # Mirrors DiagonalGaussianDistribution(dim, mean=0.0, stddev=2.0)
    dim = 128
    batch_size = 8
    mean_val = 0.0
    stddev_val = 2.0

    mean_buf = mean_val * jnp.ones((dim,), dtype=jnp.float32)
    stddev_buf = stddev_val * jnp.ones((dim,), dtype=jnp.float32)

    key = jax.random.PRNGKey(0)
    out = diagonal_gaussian_sample(batch_size, mean_buf, stddev_buf, key)
    out = jax.block_until_ready(out)

    assert out.shape == (batch_size, dim)
    assert out.dtype == jnp.float32
    assert bool(jnp.all(jnp.isfinite(out)))
    # Sanity check: sample moments should be roughly (0, 2) for N(0, 2^2).
    emp_mean = float(jnp.mean(out))
    emp_std = float(jnp.std(out))
    assert abs(emp_mean) < 1.0, emp_mean
    assert 1.0 < emp_std < 3.0, emp_std

    print("KERNEL_OK")
</pallas_src>

<mosaic_0001>
module attributes {stable_mosaic.version = 11 : i64} {
  func.func @_diag_gaussian_kernel(%arg0: i32, %arg1: memref<1x128xf32, #tpu.memory_space<vmem>>, %arg2: memref<1x128xf32, #tpu.memory_space<vmem>>, %arg3: memref<8x128xi32, #tpu.memory_space<vmem>>, %arg4: memref<8x128xi32, #tpu.memory_space<vmem>>, %arg5: memref<16x128xf32, #tpu.memory_space<vmem>>) attributes {dimension_semantics = [#tpu.dimension_semantics<parallel>], iteration_bounds = array<i64: 1>, scalar_prefetch = 0 : i64, scratch_operands = 0 : i64, tpu.core_type = #tpu.core_type<tc>, window_params = [{pipeline_mode = #tpu.pipeline_mode<synchronous>, transform_indices = @transform_0, window_bounds = array<i64: 1, 128>}, {pipeline_mode = #tpu.pipeline_mode<synchronous>, transform_indices = @transform_1, window_bounds = array<i64: 1, 128>}, {transform_indices = @transform_2, window_bounds = array<i64: 8, 128>}, {transform_indices = @transform_3, window_bounds = array<i64: 8, 128>}, {transform_indices = @transform_4, window_bounds = array<i64: 16, 128>}]} {
    %c0 = arith.constant 0 : index
    %c0_0 = arith.constant 0 : index
    %0 = vector.load %arg3[%c0, %c0_0] : memref<8x128xi32, #tpu.memory_space<vmem>>, vector<8x128xi32>
    %c8_i32 = arith.constant 8 : i32
    %1 = vector.broadcast %c8_i32 : i32 to vector<8x128xi32>
    %2 = arith.shrui %0, %1 : vector<8x128xi32>
    %3 = arith.sitofp %2 : vector<8x128xi32> to vector<8x128xf32>
    %cst = arith.constant 5.000000e-01 : f32
    %4 = vector.broadcast %cst : f32 to vector<8x128xf32>
    %5 = arith.addf %3, %4 : vector<8x128xf32>
    %cst_1 = arith.constant 5.96046448E-8 : f32
    %6 = vector.broadcast %cst_1 : f32 to vector<8x128xf32>
    %7 = arith.mulf %5, %6 : vector<8x128xf32>
    %c0_2 = arith.constant 0 : index
    %c0_3 = arith.constant 0 : index
    %8 = vector.load %arg4[%c0_2, %c0_3] : memref<8x128xi32, #tpu.memory_space<vmem>>, vector<8x128xi32>
    %c8_i32_4 = arith.constant 8 : i32
    %9 = vector.broadcast %c8_i32_4 : i32 to vector<8x128xi32>
    %10 = arith.shrui %8, %9 : vector<8x128xi32>
    %11 = arith.sitofp %10 : vector<8x128xi32> to vector<8x128xf32>
    %cst_5 = arith.constant 5.000000e-01 : f32
    %12 = vector.broadcast %cst_5 : f32 to vector<8x128xf32>
    %13 = arith.addf %11, %12 : vector<8x128xf32>
    %cst_6 = arith.constant 5.96046448E-8 : f32
    %14 = vector.broadcast %cst_6 : f32 to vector<8x128xf32>
    %15 = arith.mulf %13, %14 : vector<8x128xf32>
    %16 = math.log %7 : vector<8x128xf32>
    %cst_7 = arith.constant -2.000000e+00 : f32
    %17 = vector.broadcast %cst_7 : f32 to vector<8x128xf32>
    %18 = arith.mulf %17, %16 : vector<8x128xf32>
    %19 = math.sqrt %18 : vector<8x128xf32>
    %cst_8 = arith.constant 6.28318548 : f32
    %20 = vector.broadcast %cst_8 : f32 to vector<8x128xf32>
    %21 = arith.mulf %20, %15 : vector<8x128xf32>
    %22 = math.cos %21 : vector<8x128xf32>
    %23 = arith.mulf %19, %22 : vector<8x128xf32>
    %24 = math.sin %21 : vector<8x128xf32>
    %25 = arith.mulf %19, %24 : vector<8x128xf32>
    %c0_9 = arith.constant 0 : index
    %c0_10 = arith.constant 0 : index
    %26 = vector.load %arg1[%c0_9, %c0_10] : memref<1x128xf32, #tpu.memory_space<vmem>>, vector<1x128xf32>
    %c0_11 = arith.constant 0 : index
    %c0_12 = arith.constant 0 : index
    %27 = vector.load %arg2[%c0_11, %c0_12] : memref<1x128xf32, #tpu.memory_space<vmem>>, vector<1x128xf32>
    %28 = vector.broadcast %27 : vector<1x128xf32> to vector<8x128xf32>
    %29 = arith.mulf %28, %23 : vector<8x128xf32>
    %30 = vector.broadcast %26 : vector<1x128xf32> to vector<8x128xf32>
    %31 = arith.addf %30, %29 : vector<8x128xf32>
    %c0_13 = arith.constant 0 : index
    %c0_14 = arith.constant 0 : index
    %32 = vector.load %arg5[%c0_13, %c0_14] : memref<16x128xf32, #tpu.memory_space<vmem>>, vector<8x128xf32>
    tpu.vector_store %arg5[%c0_13, %c0_14], %31 {strides = array<i32>} : memref<16x128xf32, #tpu.memory_space<vmem>>, vector<8x128xf32>,
    %33 = vector.broadcast %27 : vector<1x128xf32> to vector<8x128xf32>
    %34 = arith.mulf %33, %25 : vector<8x128xf32>
    %35 = vector.broadcast %26 : vector<1x128xf32> to vector<8x128xf32>
    %36 = arith.addf %35, %34 : vector<8x128xf32>
    %c8 = arith.constant 8 : index
    %c0_15 = arith.constant 0 : index
    %37 = vector.load %arg5[%c8, %c0_15] : memref<16x128xf32, #tpu.memory_space<vmem>>, vector<8x128xf32>
    tpu.vector_store %arg5[%c8, %c0_15], %36 {strides = array<i32>} : memref<16x128xf32, #tpu.memory_space<vmem>>, vector<8x128xf32>,
    return
  }
  func.func @transform_0(%arg0: i32) -> (i32, i32) {
    %c0_i32 = arith.constant 0 : i32
    %c0_i32_0 = arith.constant 0 : i32
    %c0_i32_1 = arith.constant 0 : i32
    return %c0_i32, %c0_i32_0 : i32, i32
  }
  func.func @transform_1(%arg0: i32) -> (i32, i32) {
    %c0_i32 = arith.constant 0 : i32
    %c0_i32_0 = arith.constant 0 : i32
    %c0_i32_1 = arith.constant 0 : i32
    return %c0_i32, %c0_i32_0 : i32, i32
  }
  func.func @transform_2(%arg0: i32) -> (i32, i32) {
    %c0_i32 = arith.constant 0 : i32
    %c0_i32_0 = arith.constant 0 : i32
    return %arg0, %c0_i32 : i32, i32
  }
  func.func @transform_3(%arg0: i32) -> (i32, i32) {
    %c0_i32 = arith.constant 0 : i32
    %c0_i32_0 = arith.constant 0 : i32
    return %arg0, %c0_i32 : i32, i32
  }
  func.func @transform_4(%arg0: i32) -> (i32, i32) {
    %c0_i32 = arith.constant 0 : i32
    %c0_i32_0 = arith.constant 0 : i32
    return %arg0, %c0_i32 : i32, i32
  }
}

</mosaic_0001>

<bundles_post_ra>
// kernel: tpu_custom_call.1
= control target key start
LH: loop header
LB: loop body
LE: loop exit
PB: predicated region body
PF: predicated region fallthrough
CT: control target
= control target key end

     0   :  { %9 = vsyncpa [#allocation3], 0  ;;  %s517_s0 = inlined_call_operand.hbm [shape: f32[1,128], index: 0, kind: input, shape index: {}]   ;;  %s518_s1 = inlined_call_operand.vmem [shape: f32[1,128], index: 1, kind: input, shape index: {}]   ;;  %s519_s2 = inlined_call_operand.hbm [shape: u32[8,128], index: 2, kind: input, shape index: {}]   ;;  %s520_s3 = inlined_call_operand.vmem [shape: u32[8,128], index: 3, kind: input, shape index: {}]   ;;  %s521_s4 = inlined_call_operand.hbm [shape: f32[16,128], index: 4, kind: output, shape index: {}]  }
   0x1   :  { %10 = vsyncpa [#allocation6], 0 }
   0x2   :  { %11 = vsyncpa [#allocation4], 0  ;;  %s415_s15 = smov [#allocation2]   ;;  %s416_s17 = smov [#allocation5]  }
   0x3   :  { %s18_s16 = sshll.u32 %s415_s15, 4  ;;  %s30_s18 = sshll.u32 %s416_s17, 4  ;;  %s19_s16 = int_to_ptr.vmem [resolvable:$true] %s18_s16  ;;  %s31_s18 = int_to_ptr.vmem [resolvable:$true] %s30_s18 }
   0x4   :  { %s343_s21 = scalar_lea.hbm %s517_s0, 16 }
   0x5   :  { %p344_p0 = scmp.ne.s32.totalorder %s517_s0, %s343_s21  ;;  %p347_p1 = scmp.lt.u32.totalorder %s343_s21, %s517_s0 }
   0x7   :  { %p349_p2 = pnand %p347_p1, %p344_p0 }
   0x9   :  { %352 = shalt.err (!%p349_p2)
}
   0xa   :  { %s353_s26 = scalar_lea.vmem %s19_s16, 16  ;;  %s357_s27 = scalar_lea.vmem %s19_s16, 32 }
   0xb   :  { %p354_p3 = scmp.ne.s32.totalorder %s19_s16, %s353_s26  ;;  %p358_p4 = scmp.lt.s32.totalorder %s19_s16, %s19_s16 }
   0xc   :  { %p359_p5 = scmp.lt.s32.totalorder %s357_s27, %s353_s26 }
   0xe   :  { %p360_p6 = por %p359_p5, %p358_p4 }
  0x10   :  { %p361_p7 = pnand %p360_p6, %p354_p3 }
  0x12   :  { %364 = shalt.err (!%p361_p7)
}
  0x13   :  { %21 = dma.hbm_to_vmem [thread:$0]  %s517_s0, 16, %s19_s16, [#allocation3]  }
  0x14   :  { %s365_s6 = scalar_lea.hbm %s519_s2, 128 }
  0x15   :  { %p366_p8 = scmp.ne.s32.totalorder %s519_s2, %s365_s6  ;;  %p369_p9 = scmp.lt.u32.totalorder %s365_s6, %s519_s2 }
  0x17   :  { %p371_p10 = pnand %p369_p9, %p366_p8 }
  0x19   :  { %374 = shalt.err (!%p371_p10)
}
  0x1a   :  { %s375_s11 = scalar_lea.vmem %s31_s18, 128  ;;  %p380_p12 = scmp.lt.s32.totalorder %s31_s18, %s31_s18 }
  0x1b   :  { %p376_p11 = scmp.ne.s32.totalorder %s31_s18, %s375_s11  ;;  %p381_p13 = scmp.lt.s32.totalorder %s375_s11, %s375_s11 }
  0x1d   :  { %p382_p0 = por %p381_p13, %p380_p12 }
  0x1f   :  { %p383_p1 = pnand %p382_p0, %p376_p11 }
  0x21   :  { %386 = shalt.err (!%p383_p1)
}
  0x22   :  { %33 = dma.hbm_to_vmem [thread:$0]  %s519_s2, 128, %s31_s18, [#allocation6]  }
  0x23   :  { %409 = dma.done.wait [#allocation3], 16  }
  0x24   :  { %410 = vsyncadd [#allocation3], 4294967280 }
  0x25   :  { %411 = dma.done.wait [#allocation6], 128  }
  0x26   :  { %412 = vsyncadd [#allocation6], 4294967168  ;;  %v47_v0 = vld [vmem:[%s520_s3] sm:$0xff]  ;;  %v417_v17 = vmov 683565275   ;;  %v42_v40 = vld [vmem:[#allocation5] sm:$0xff] }
  0x27   :  { %v48_v1 = vshrl.u32 %v47_v0, 8  ;;  %v418_v19 = vmov 2475754826   ;;  %v419_v21 = vmov 2131351028   ;;  %v43_v50 = vshrl.u32 %v42_v40, 8 }
  0x28   :  { %v420_v27 = vmov 2102212464   ;;  %v421_v30 = vmov 920167782   ;;  %v422_v33 = vmov 1326507024  }
  0x29   :  { %v49_v2 = vcvt.s32.f32 %v48_v1  ;;  %v44_v59 = vcvt.s32.f32 %v43_v50  ;;  %s423_s15 = smov [#allocation7]  }
  0x2a   :  { %s297_s16 = sshll.u32 %s423_s15, 4  ;;  %s298_s16 = int_to_ptr.vmem [resolvable:$true] %s297_s16 }
  0x2b   :  { %v50_v3 = vadd.f32 0.5, %v49_v2  ;;  %v45_v63 = vadd.f32 0.5, %v44_v59  ;;  %s387_s17 = scalar_lea.vmem %s298_s16, 256  ;;  %p392_p3 = scmp.lt.s32.totalorder %s298_s16, %s298_s16 }
  0x2c   :  { %p388_p2 = scmp.ne.s32.totalorder %s298_s16, %s387_s17  ;;  %p393_p4 = scmp.lt.s32.totalorder %s387_s17, %s387_s17 }
  0x2d   :  { %v51_v4 = vmul.f32 5.9604645e-08, %v50_v3  ;;  %v46_v2 = vmul.f32 5.9604645e-08, %v45_v63 }
  0x2e   :  { %p394_p5 = por %p393_p4, %p392_p3 }
  0x2f   :  { %v478_v5 = vmul.f32 6.2831855, %v51_v4  ;;  %335 = vlog2.f32 %v46_v2 }
  0x30   :  { %p395_p6 = pnand %p394_p5, %p388_p2 }
  0x31   :  { %v66_v6 = vand.u32 2139095040, %v478_v5  ;;  %v63_v7 = vand.u32 2147483647, %v478_v5  ;;  %vm65_vm7 = vcmp.lt.s32.totalorder %v478_v5, 0 }
  0x33   :  { %v67_v8 = vshrl.u32 %v66_v6, 23  ;;  %v70_v10 = vand.u32 8388607, %v63_v7  ;;  %vm64_vm8 = vcmp.le.f32.partialorder %v63_v7, 0.7853982 }
  0x35   :  { %v310_v9 = vadd.s32 4294967169, %v67_v8  ;;  %v71_v12 = vor.u32 8388608, %v70_v10 }
  0x37   :  { %v73_v11 = vadd.s32 1, %v310_v9  ;;  %v111_v23 = vshll.u32 %v71_v12, 8 }
  0x39   :  { %vm74_vm0 = vcmp.gt.s32.totalorder %v73_v11, 0  ;;  %v336_v12 = vpop.eup %335 }
  0x3a   :  { %v75_v13 = vsel %vm74_vm0, %v73_v11, 0 }
  0x3b   :  { %v77_v14 = vand.u32 31, %v75_v13  ;;  %v76_v15 = vshrl.u32 %v75_v13, 5 }
  0x3d   :  { %v78_v16 = vsub.s32 32, %v77_v14  ;;  %v80_v18 = vshll.u32 %v417_v17, %v77_v14  ;;  %v83_v20 = vshll.u32 %v418_v19, %v77_v14  ;;  %v86_v22 = vshll.u32 %v419_v21, %v77_v14 }
  0x3e   :  { %v89_v29 = vshll.u32 %v420_v27, %v77_v14  ;;  %v92_v32 = vshll.u32 %v421_v30, %v77_v14  ;;  %vm95_vm1 = vcmp.lt.s32.totalorder %v76_v15, 1  ;;  %vm96_vm2 = vcmp.lt.s32.totalorder %v76_v15, 2 }
  0x3f   :  { %v79_v24 = vshrl.u32 %v417_v17, %v78_v16  ;;  %v81_v25 = vshrl.u32 %v418_v19, %v78_v16  ;;  %v84_v26 = vshrl.u32 %v419_v21, %v78_v16  ;;  %v87_v28 = vshrl.u32 %v420_v27, %v78_v16 }
  0x40   :  { %v90_v31 = vshrl.u32 %v421_v30, %v78_v16  ;;  %v93_v34 = vshrl.u32 %v422_v33, %v78_v16  ;;  %vm97_vm3 = vcmp.lt.s32.totalorder %v76_v15, 3  ;;  %vm98_vm4 = vcmp.lt.s32.totalorder %v76_v15, 4 }
  0x41   :  { %v82_v35 = vor.u32 %v81_v25, %v80_v18  ;;  %v85_v36 = vor.u32 %v84_v26, %v83_v20  ;;  %v88_v37 = vor.u32 %v87_v28, %v86_v22  ;;  %v53_v17 = vmul.f32 0.6931472, %v336_v12 }
  0x42   :  { %v91_v38 = vor.u32 %v90_v31, %v89_v29  ;;  %v94_v39 = vor.u32 %v93_v34, %v92_v32 }
  0x43   :  { %v99_v41 = vsel %vm95_vm1, %v79_v24, %v82_v35  ;;  %v103_v42 = vsel %vm95_vm1, %v82_v35, %v85_v36  ;;  %v107_v43 = vsel %vm95_vm1, %v85_v36, %v88_v37  ;;  %v100_v44 = vsel %vm98_vm4, %v88_v37, 2102212464 }
  0x44   :  { %v104_v45 = vsel %vm98_vm4, %v91_v38, 920167782  ;;  %v108_v46 = vsel %vm98_vm4, %v94_v39, 1326507024  ;;  %v101_v47 = vsel %vm97_vm3, %v85_v36, %v100_v44  ;;  %v54_v22 = vmul.f32 -2.0, %v53_v17 }
  0x45   :  { %v105_v48 = vsel %vm97_vm3, %v88_v37, %v104_v45  ;;  %v109_v49 = vsel %vm97_vm3, %v91_v38, %v108_v46  ;;  %v102_v51 = vsel %vm96_vm2, %v99_v41, %v101_v47  ;;  %vm155_vm1 = vweird.f32 %v478_v5 }
  0x46   :  { %v106_v52 = vsel %vm96_vm2, %v103_v42, %v105_v48  ;;  %v110_v53 = vsel %vm96_vm2, %v107_v43, %v109_v49  ;;  %v118_v58 = vmul.u32 %v111_v23, %v102_v51  ;;  %337 = vrsqrt.f32 %v54_v22  ;;  %v318_v51 = vld [vmem:[%s518_s1] ss:$0 sm:$0xff] }
  0x47   :  { %v487_v54 = vmul.u32.u64.low %v111_v23, %v110_v53  ;;  %v488_v55 = vmul.u32.u64.high %v111_v23, %v110_v53, %v487_v54  ;;  %v490_v56 = vmul.u32.u64.low %v111_v23, %v106_v52  ;;  %v491_v57 = vmul.u32.u64.high %v111_v23, %v106_v52, %v490_v56 }
  0x48   :  { %vm57_vm9 = vcmp.eq.f32.partialorder %v54_v22, inf  ;;  %vm59_vm10 = vcmp.eq.f32.partialorder %v54_v22, 0.0  ;;  %v60_v39 = vand.u32 2147483648, %v54_v22 }
  0x49   :  { %vm120_vm5 = vc.u32 %v488_v55, %v490_v56  ;;  %v121_v60 = vadd.s32 1, %v491_v57  ;;  %v119_v11 = vadd.s32 %v490_v56, %v488_v55  ;;  %v319_v55 = vld [vmem:[#allocation2] ss:$0 sm:$0xff] }
  0x4b   :  { %v122_v61 = vsel %vm120_vm5, %v121_v60, %v491_v57 }
  0x4c   :  { %v123_v62 = vadd.s32 %v122_v61, %v118_v58 }
  0x4e   :  { %v124_v0 = vadd.s32 536870912, %v123_v62 }
  0x50   :  { %v125_v1 = vshrl.u32 %v124_v0, 30  ;;  %v338_v34 = vpop.eup %337 }
  0x51   :  { %v56_v37 = vmul.f32 %v338_v34, %v54_v22 }
  0x52   :  { %v126_v3 = vshll.u32 %v125_v1, 30  ;;  %v149_v26 = vsub.s32 4, %v125_v1 }
  0x53   :  { %v58_v40 = vsel %vm57_vm9, %v54_v22, %v56_v37 }
  0x54   :  { %v127_v4 = vsub.s32 %v123_v62, %v126_v3  ;;  %v150_v29 = vsel %vm65_vm7, %v149_v26, %v125_v1  ;;  %v61_v45 = vsel %vm59_vm10, %v60_v39, %v58_v40 }
  0x55   :  { %v152_v32 = vsel %vm64_vm8, 0, %v150_v29 }
  0x56   :  { %v129_v6 = vsub.s32 0, %v127_v4  ;;  %v260_v33 = vadd.s32 3, %v152_v32  ;;  %v156_v35 = vand.u32 3, %v152_v32 }
  0x58   :  { %v311_v8 = vmin.u32 %v129_v6, %v127_v4  ;;  %v261_v36 = vand.u32 3, %v260_v33  ;;  %vm161_vm11 = vcmp.eq.s32.totalorder %v156_v35, 2  ;;  %vm158_vm13 = vcmp.eq.s32.totalorder %v156_v35, 0 }
  0x59   :  { %vm157_vm15 = vcmp.lt.s32.totalorder %v156_v35, 2 }
  0x5a   :  { %v131_v9 = vclz %v311_v8  ;;  %vm266_vm12 = vcmp.eq.s32.totalorder %v261_v36, 2  ;;  %vm263_vm14 = vcmp.eq.s32.totalorder %v261_v36, 0  ;;  %vm262_vm0 = vcmp.lt.s32.totalorder %v261_v36, 2 }
  0x5c   :  { %v312_v10 = vadd.s32 4294967294, %v131_v9 }
  0x5e   :  { %vm313_vm6 = vcmp.lt.s32.totalorder %v312_v10, 0 }
  0x5f   :  { %v134_v13 = vsel %vm313_vm6, 0, %v312_v10 }
  0x60   :  { %v135_v14 = vsub.s32 32, %v134_v13  ;;  %v136_v15 = vshll.u32 %v127_v4, %v134_v13  ;;  %v139_v16 = vsub.s32 4294967266, %v134_v13 }
  0x62   :  { %v137_v18 = vshrl.u32 %v119_v11, %v135_v14  ;;  %v140_v19 = vadd.s32 127, %v139_v16 }
  0x64   :  { %v138_v20 = vor.u32 %v137_v18, %v136_v15  ;;  %v141_v21 = vshll.u32 %v140_v19, 23 }
  0x66   :  { %v142_v23 = vor.u32 4788187, %v141_v21  ;;  %v145_v24 = vcvt.s32.f32 %v138_v20 }
  0x68   :  { %v143_v25 = vand.u32 2147483647, %v142_v23 }
  0x6a   :  { %v146_v27 = vmul.f32 %v145_v24, %v143_v25 }
  0x6c   :  { %v147_v28 = vxor.u32 2147483648, %v146_v27 }
  0x6e   :  { %v148_v30 = vsel %vm65_vm7, %v147_v28, %v146_v27 }
  0x6f   :  { %v151_v31 = vsel %vm64_vm8, %v478_v5, %v148_v30 }
  0x70   :  { %339 = vcosq.f32 %v151_v31 }
  0x71   :  { %341 = vsinq.f32 %v151_v31 }
  0x7a   :  { %v340_v38 = vpop.eup %339 }
  0x7b   :  { %v342_v7 = vpop.eup %341  ;;  %v162_v41 = vxor.u32 2147483648, %v340_v38 }
  0x7c   :  { %v159_v42 = vxor.u32 2147483648, %v342_v7 }
  0x7d   :  { %v163_v43 = vsel %vm161_vm11, %v162_v41, %v342_v7  ;;  %v268_v44 = vsel %vm266_vm12, %v162_v41, %v342_v7 }
  0x7e   :  { %v160_v46 = vsel %vm158_vm13, %v340_v38, %v159_v42  ;;  %v265_v47 = vsel %vm263_vm14, %v340_v38, %v159_v42 }
  0x7f   :  { %v164_v48 = vsel %vm157_vm15, %v160_v46, %v163_v43  ;;  %v269_v49 = vsel %vm262_vm0, %v265_v47, %v268_v44 }
  0x80   :  { %v165_v50 = vsel %vm155_vm1, nan, %v164_v48  ;;  %v270_v52 = vsel %vm155_vm1, nan, %v269_v49 }
  0x81   :  { %v166_v53 = vmul.f32 %v165_v50, %v61_v45  ;;  %v271_v54 = vmul.f32 %v270_v52, %v61_v45 }
  0x83   :  { %v280_v56 = vmul.f32 %v318_v51, %v166_v53  ;;  %v289_v5 = vmul.f32 %v318_v51, %v271_v54 }
  0x85   :  { %v287_v57 = vadd.f32 %v319_v55, %v280_v56  ;;  %v290_v58 = vadd.f32 %v319_v55, %v289_v5 }
  0x87   :  { %288 = vst [vmem:[#allocation7] sm:$0xff] %v287_v57  ;;  %291 = vst [vmem:[#allocation7 + $0x8] sm:$0xff] %v290_v58 }
  0x88   :  { %398 = shalt.err (!%p395_p6)
}
  0x89   :  { %s399_s19 = scalar_lea.hbm %s521_s4, 256 }
  0x8a   :  { %p400_p7 = scmp.ne.s32.totalorder %s521_s4, %s399_s19  ;;  %p403_p8 = scmp.lt.u32.totalorder %s399_s19, %s521_s4 }
  0x8c   :  { %p405_p9 = pnand %p403_p8, %p400_p7 }
  0x8e   :  { %408 = shalt.err (!%p405_p9)
}
  0x8f   :  { %s424_s24 = smov 128   ;;  %s425_s25 = smov 8  }
  0x90   :  { %303 = dma.vmem_to_hbm [thread:$0]  %s298_s16, 256, %s521_s4, [#allocation4], %s424_s24, %s424_s24, %s425_s25  }
  0x91   :  { %413 = dma.done.wait [#allocation4], 256  }
  0x92   :  { %414 = vsyncadd [#allocation4], 4294967040 }
  0x93   :  { %307 = vsyncpa [#allocation3], 1 }
  0x94   :  { %308 = vsyncpa [#allocation6], 1 }
  0x95   :  { %309 = vsyncpa [#allocation4], 1 }

</bundles_post_ra>
